<compile_context>
chip_gen: v6e
topology: v6e:2x2x1
jax: 0.10.0
libtpu: 0.0.40
codegen_flags: <defaults>
</compile_context>

<pallas_src>
import functools
import math

import jax
import jax.numpy as jnp
from jax.experimental import pallas as pl
from jax.experimental.pallas import tpu as pltpu


def _eca_kernel_size(num_channels, gamma=2, b=1):
    """Matches the PyTorch module's kernel-size rule."""
    t = int(abs(math.log(num_channels, 2) + b) / gamma)
    return t if t % 2 else t + 1


def _channel_attention_kernel(w_ref, x_ref, o_ref, sum_acc, max_acc, pad_ref,
                              *, ksize, pad, inv_hw):
    # w_ref:   (2*ksize,) f32 SMEM   - flattened Conv1d(2, 1, k) weight (OIH order).
    # x_ref:   (1, C, t_hw) VMEM     - block of the (N, C, H*W) input.
    # o_ref:   (1, C, 1) VMEM        - output block (written at last HW step only).
    # sum_acc: (C, 1) f32 VMEM       - running per-channel sum.
    # max_acc: (C, 1) f32 VMEM       - running per-channel max.
    # pad_ref: (C + 2*pad, 2) f32 VMEM - zero-padded [avg | max] columns for the conv.
    h = pl.program_id(1)
    n_hw = pl.num_programs(1)
    C = sum_acc.shape[0]

    @pl.when(h == 0)
    def _():
        sum_acc[...] = jnp.zeros_like(sum_acc)
        max_acc[...] = jnp.full_like(max_acc, -jnp.inf)

    # Single fused pass over the tile: one stream of x feeds both reductions.
    x = x_ref[0].astype(jnp.float32)                                 # (C, t_hw)
    sum_acc[...] += jnp.sum(x, axis=1, keepdims=True)
    max_acc[...] = jnp.maximum(max_acc[...], jnp.max(x, axis=1, keepdims=True))

    @pl.when(h == n_hw - 1)
    def _():
        avg = sum_acc[...] * inv_hw                                  # (C, 1)
        mx = max_acc[...]                                            # (C, 1)

        # Tiny zero-padded staging buffer for the "same" conv over channels.
        pad_ref[...] = jnp.zeros_like(pad_ref)
        pad_ref[pl.ds(pad, C), 0:1] = avg
        pad_ref[pl.ds(pad, C), 1:2] = mx

        # Unrolled k-tap Conv1d(2 -> 1) along the channel axis, bias=False.
        acc = jnp.zeros((C, 1), jnp.float32)
        for j in range(ksize):
            acc = acc + w_ref[j] * pad_ref[pl.ds(j, C), 0:1] \
                      + w_ref[ksize + j] * pad_ref[pl.ds(j, C), 1:2]

        o_ref[0, :, :] = jax.nn.sigmoid(acc).astype(o_ref.dtype)


def _pick_hw_tile(hw, max_tile):
    """Largest 128-multiple tile dividing hw (<= max_tile); else the full extent."""
    if hw <= max_tile:
        return hw
    t = (max_tile // 128) * 128
    while t >= 128:
        if hw % t == 0:
            return t
        t -= 128
    return hw


def channel_attention(x, conv_weight, *, max_hw_tile=2048):
    """x: (N, C, H, W); conv_weight: (1, 2, k). Returns sigmoid gate (N, C, 1, 1)."""
    N, C, H, W = x.shape
    k = conv_weight.shape[-1]
    pad = k // 2
    HW = H * W
    t_hw = _pick_hw_tile(HW, max_hw_tile)
    n_hw = HW // t_hw

    x_flat = x.reshape(N, C, HW)                       # free: contiguous reshape
    w_flat = conv_weight.reshape(-1).astype(jnp.float32)   # (2*k,), OIH order

    kernel = functools.partial(_channel_attention_kernel,
                               ksize=k, pad=pad, inv_hw=1.0 / HW)

    itemsize = jnp.dtype(x.dtype).itemsize
    cost = pl.CostEstimate(
        flops=2 * N * C * HW + 4 * N * C * k,          # sum+max pass, conv MACs
        transcendentals=N * C,                         # sigmoid exp
        bytes_accessed=N * C * HW * itemsize + N * C * itemsize + 2 * k * 4,
    )

    out = pl.pallas_call(
        kernel,
        out_shape=jax.ShapeDtypeStruct((N, C, 1), x.dtype),
        grid_spec=pltpu.PrefetchScalarGridSpec(
            num_scalar_prefetch=0,
            grid=(N, n_hw),
            in_specs=[
                # Flattened conv weight in SMEM for scalar tap reads.
                pl.BlockSpec(memory_space=pltpu.MemorySpace.SMEM),
                # (1, C, t_hw) tile: C on sublanes, H*W (lane-dense) on lanes.
                pl.BlockSpec((1, C, t_hw), lambda n, h: (n, 0, h)),
            ],
            out_specs=pl.BlockSpec((1, C, 1), lambda n, h: (n, 0, 0)),
            scratch_shapes=[
                pltpu.VMEM((C, 1), jnp.float32),            # sum accumulator
                pltpu.VMEM((C, 1), jnp.float32),            # max accumulator
                pltpu.VMEM((C + 2 * pad, 2), jnp.float32),  # padded [avg|max]
            ],
        ),
        compiler_params=pltpu.CompilerParams(
            dimension_semantics=("parallel", "arbitrary"),
            vmem_limit_bytes=32 * 1024 * 1024,
        ),
        cost_estimate=cost,
    )(w_flat, x_flat)
    return out.reshape(N, C, 1, 1)


def _reference(x, conv_weight):
    """Pure-JAX reference matching the PyTorch ChannelAttention forward."""
    k = conv_weight.shape[-1]
    pad = k // 2
    avg = jnp.mean(x, axis=(2, 3))                               # (N, C)
    mx = jnp.max(x, axis=(2, 3))                                 # (N, C)
    stacked = jnp.stack([avg, mx], axis=1).astype(jnp.float32)   # (N, 2, C)
    out = jax.lax.conv_general_dilated(
        stacked, conv_weight.astype(jnp.float32),
        window_strides=(1,), padding=((pad, pad),),
        dimension_numbers=("NCH", "OIH", "NCH"))                 # (N, 1, C)
    out = jax.nn.sigmoid(out)
    return jnp.transpose(out, (0, 2, 1))[..., None].astype(x.dtype)  # (N, C, 1, 1)


if __name__ == "__main__":
    key = jax.random.PRNGKey(0)
    kx, kw = jax.random.split(key)

    N, C, H, W = 2, 32, 16, 16
    k = _eca_kernel_size(C, gamma=2, b=1)     # C=32 -> k=3, padding=1

    x = jax.random.normal(kx, (N, C, H, W), dtype=jnp.float32)
    # Deterministic synthetic Conv1d(2, 1, k, bias=False) weight.
    conv_weight = 0.1 * jax.random.normal(kw, (1, 2, k), dtype=jnp.float32)

    # max_hw_tile=128 -> grid (N, 2): exercises the multi-step reduction path.
    out = channel_attention(x, conv_weight, max_hw_tile=128)
    out = jax.block_until_ready(out)

    ref = _reference(x, conv_weight)
    assert out.shape == (N, C, 1, 1), out.shape
    assert jnp.allclose(out, ref, atol=1e-4, rtol=1e-4), "mismatch vs reference"

    print("KERNEL_OK")
</pallas_src>

<mosaic_0001>
module attributes {stable_mosaic.version = 11 : i64} {
  func.func @_channel_attention_kernel(%arg0: i32, %arg1: i32, %arg2: memref<6xf32, #tpu.memory_space<smem>>, %arg3: memref<1x32x128xf32, #tpu.memory_space<vmem>>, %arg4: memref<1x32x1xf32, #tpu.memory_space<vmem>>, %arg5: memref<32x1xf32, #tpu.memory_space<vmem>>, %arg6: memref<32x1xf32, #tpu.memory_space<vmem>>, %arg7: memref<34x2xf32, #tpu.memory_space<vmem>>) attributes {dimension_semantics = [#tpu.dimension_semantics<parallel>, #tpu.dimension_semantics<arbitrary>], iteration_bounds = array<i64: 2, 2>, scalar_prefetch = 0 : i64, scratch_operands = 3 : i64, tpu.core_type = #tpu.core_type<tc>, window_params = [{transform_indices = @transform_0, window_bounds = array<i64: 6>}, {transform_indices = @transform_1, window_bounds = array<i64: 1, 32, 128>}, {transform_indices = @transform_2, window_bounds = array<i64: 1, 32, 1>}]} {
    %c0_i32 = arith.constant 0 : i32
    %0 = arith.cmpi eq, %arg1, %c0_i32 : i32
    %1 = arith.extui %0 : i1 to i32
    %c0_i32_0 = arith.constant 0 : i32
    %2 = arith.cmpi ne, %1, %c0_i32_0 : i32
    scf.if %2 {
      %cst_13 = arith.constant 0.000000e+00 : f32
      %18 = vector.broadcast %cst_13 : f32 to vector<32x1xf32>
      %c0_14 = arith.constant 0 : index
      %c0_15 = arith.constant 0 : index
      %19 = vector.load %arg5[%c0_14, %c0_15] : memref<32x1xf32, #tpu.memory_space<vmem>>, vector<32x1xf32>
      tpu.vector_store %arg5[%c0_14, %c0_15], %18 {strides = array<i32>} : memref<32x1xf32, #tpu.memory_space<vmem>>, vector<32x1xf32>,
      %cst_16 = arith.constant 0xFF800000 : f32
      %20 = vector.broadcast %cst_16 : f32 to vector<32x1xf32>
      %c0_17 = arith.constant 0 : index
      %c0_18 = arith.constant 0 : index
      %21 = vector.load %arg6[%c0_17, %c0_18] : memref<32x1xf32, #tpu.memory_space<vmem>>, vector<32x1xf32>
      tpu.vector_store %arg6[%c0_17, %c0_18], %20 {strides = array<i32>} : memref<32x1xf32, #tpu.memory_space<vmem>>, vector<32x1xf32>,
    } else {
    }
    %c0 = arith.constant 0 : index
    %c0_1 = arith.constant 0 : index
    %c0_2 = arith.constant 0 : index
    %3 = vector.load %arg3[%c0, %c0_1, %c0_2] : memref<1x32x128xf32, #tpu.memory_space<vmem>>, vector<1x32x128xf32>
    %4 = vector.shape_cast %3 : vector<1x32x128xf32> to vector<32x128xf32>
    %c0_3 = arith.constant 0 : index
    %c0_4 = arith.constant 0 : index
    %5 = vector.load %arg5[%c0_3, %c0_4] : memref<32x1xf32, #tpu.memory_space<vmem>>, vector<32x1xf32>
    %cst = arith.constant dense<0.000000e+00> : vector<32xf32>
    %6 = vector.multi_reduction <add>, %4, %cst [1] : vector<32x128xf32> to vector<32xf32>
    %7 = vector.shape_cast %6 : vector<32xf32> to vector<32x1xf32>
    %8 = arith.addf %5, %7 : vector<32x1xf32>
    %c0_5 = arith.constant 0 : index
    %c0_6 = arith.constant 0 : index
    %9 = vector.load %arg5[%c0_5, %c0_6] : memref<32x1xf32, #tpu.memory_space<vmem>>, vector<32x1xf32>
    tpu.vector_store %arg5[%c0_5, %c0_6], %8 {strides = array<i32>} : memref<32x1xf32, #tpu.memory_space<vmem>>, vector<32x1xf32>,
    %c0_7 = arith.constant 0 : index
    %c0_8 = arith.constant 0 : index
    %10 = vector.load %arg6[%c0_7, %c0_8] : memref<32x1xf32, #tpu.memory_space<vmem>>, vector<32x1xf32>
    %cst_9 = arith.constant dense<0xFF800000> : vector<32xf32>
    %11 = vector.multi_reduction <maximumf>, %4, %cst_9 [1] : vector<32x128xf32> to vector<32xf32>
    %12 = vector.shape_cast %11 : vector<32xf32> to vector<32x1xf32>
    %13 = arith.maximumf %10, %12 : vector<32x1xf32>
    %c0_10 = arith.constant 0 : index
    %c0_11 = arith.constant 0 : index
    %14 = vector.load %arg6[%c0_10, %c0_11] : memref<32x1xf32, #tpu.memory_space<vmem>>, vector<32x1xf32>
    tpu.vector_store %arg6[%c0_10, %c0_11], %13 {strides = array<i32>} : memref<32x1xf32, #tpu.memory_space<vmem>>, vector<32x1xf32>,
    %c1_i32 = arith.constant 1 : i32
    %15 = arith.cmpi eq, %arg1, %c1_i32 : i32
    %16 = arith.extui %15 : i1 to i32
    %c0_i32_12 = arith.constant 0 : i32
    %17 = arith.cmpi ne, %16, %c0_i32_12 : i32
    scf.if %17 {
      %c0_13 = arith.constant 0 : index
      %c0_14 = arith.constant 0 : index
      %18 = vector.load %arg5[%c0_13, %c0_14] : memref<32x1xf32, #tpu.memory_space<vmem>>, vector<32x1xf32>
      %cst_15 = arith.constant 3.906250e-03 : f32
      %19 = vector.broadcast %cst_15 : f32 to vector<32x1xf32>
      %20 = arith.mulf %18, %19 : vector<32x1xf32>
      %c0_16 = arith.constant 0 : index
      %c0_17 = arith.constant 0 : index
      %21 = vector.load %arg6[%c0_16, %c0_17] : memref<32x1xf32, #tpu.memory_space<vmem>>, vector<32x1xf32>
      %cst_18 = arith.constant 0.000000e+00 : f32
      %22 = vector.broadcast %cst_18 : f32 to vector<34x2xf32>
      %c0_19 = arith.constant 0 : index
      %c0_20 = arith.constant 0 : index
      %23 = vector.load %arg7[%c0_19, %c0_20] : memref<34x2xf32, #tpu.memory_space<vmem>>, vector<34x2xf32>
      tpu.vector_store %arg7[%c0_19, %c0_20], %22 {strides = array<i32>} : memref<34x2xf32, #tpu.memory_space<vmem>>, vector<34x2xf32>,
      %c1 = arith.constant 1 : index
      %c0_21 = arith.constant 0 : index
      %24 = vector.load %arg7[%c1, %c0_21] : memref<34x2xf32, #tpu.memory_space<vmem>>, vector<32x1xf32>
      tpu.vector_store %arg7[%c1, %c0_21], %20 {strides = array<i32>} : memref<34x2xf32, #tpu.memory_space<vmem>>, vector<32x1xf32>,
      %c1_22 = arith.constant 1 : index
      %c1_23 = arith.constant 1 : index
      %25 = vector.load %arg7[%c1_22, %c1_23] : memref<34x2xf32, #tpu.memory_space<vmem>>, vector<32x1xf32>
      tpu.vector_store %arg7[%c1_22, %c1_23], %21 {strides = array<i32>} : memref<34x2xf32, #tpu.memory_space<vmem>>, vector<32x1xf32>,
      %cst_24 = arith.constant 0.000000e+00 : f32
      %26 = vector.broadcast %cst_24 : f32 to vector<32x1xf32>
      %c0_25 = arith.constant 0 : index
      %27 = memref.load %arg2[%c0_25] : memref<6xf32, #tpu.memory_space<smem>>
      %c0_26 = arith.constant 0 : index
      %c0_27 = arith.constant 0 : index
      %28 = vector.load %arg7[%c0_26, %c0_27] : memref<34x2xf32, #tpu.memory_space<vmem>>, vector<32x1xf32>
      %29 = vector.broadcast %27 : f32 to vector<32x1xf32>
      %30 = arith.mulf %29, %28 : vector<32x1xf32>
      %31 = arith.addf %26, %30 : vector<32x1xf32>
      %c3 = arith.constant 3 : index
      %32 = memref.load %arg2[%c3] : memref<6xf32, #tpu.memory_space<smem>>
      %c0_28 = arith.constant 0 : index
      %c1_29 = arith.constant 1 : index
      %33 = vector.load %arg7[%c0_28, %c1_29] : memref<34x2xf32, #tpu.memory_space<vmem>>, vector<32x1xf32>
      %34 = vector.broadcast %32 : f32 to vector<32x1xf32>
      %35 = arith.mulf %34, %33 : vector<32x1xf32>
      %36 = arith.addf %31, %35 : vector<32x1xf32>
      %c1_30 = arith.constant 1 : index
      %37 = memref.load %arg2[%c1_30] : memref<6xf32, #tpu.memory_space<smem>>
      %c1_31 = arith.constant 1 : index
      %c0_32 = arith.constant 0 : index
      %38 = vector.load %arg7[%c1_31, %c0_32] : memref<34x2xf32, #tpu.memory_space<vmem>>, vector<32x1xf32>
      %39 = vector.broadcast %37 : f32 to vector<32x1xf32>
      %40 = arith.mulf %39, %38 : vector<32x1xf32>
      %41 = arith.addf %36, %40 : vector<32x1xf32>
      %c4 = arith.constant 4 : index
      %42 = memref.load %arg2[%c4] : memref<6xf32, #tpu.memory_space<smem>>
      %c1_33 = arith.constant 1 : index
      %c1_34 = arith.constant 1 : index
      %43 = vector.load %arg7[%c1_33, %c1_34] : memref<34x2xf32, #tpu.memory_space<vmem>>, vector<32x1xf32>
      %44 = vector.broadcast %42 : f32 to vector<32x1xf32>
      %45 = arith.mulf %44, %43 : vector<32x1xf32>
      %46 = arith.addf %41, %45 : vector<32x1xf32>
      %c2 = arith.constant 2 : index
      %47 = memref.load %arg2[%c2] : memref<6xf32, #tpu.memory_space<smem>>
      %c2_35 = arith.constant 2 : index
      %c0_36 = arith.constant 0 : index
      %48 = vector.load %arg7[%c2_35, %c0_36] : memref<34x2xf32, #tpu.memory_space<vmem>>, vector<32x1xf32>
      %49 = vector.broadcast %47 : f32 to vector<32x1xf32>
      %50 = arith.mulf %49, %48 : vector<32x1xf32>
      %51 = arith.addf %46, %50 : vector<32x1xf32>
      %c5 = arith.constant 5 : index
      %52 = memref.load %arg2[%c5] : memref<6xf32, #tpu.memory_space<smem>>
      %c2_37 = arith.constant 2 : index
      %c1_38 = arith.constant 1 : index
      %53 = vector.load %arg7[%c2_37, %c1_38] : memref<34x2xf32, #tpu.memory_space<vmem>>, vector<32x1xf32>
      %54 = vector.broadcast %52 : f32 to vector<32x1xf32>
      %55 = arith.mulf %54, %53 : vector<32x1xf32>
      %56 = arith.addf %51, %55 : vector<32x1xf32>
      %57 = arith.negf %56 : vector<32x1xf32>
      %58 = math.exp %57 : vector<32x1xf32>
      %cst_39 = arith.constant 1.000000e+00 : f32
      %59 = vector.broadcast %cst_39 : f32 to vector<32x1xf32>
      %60 = arith.addf %59, %58 : vector<32x1xf32>
      %61 = arith.divf %59, %60 : vector<32x1xf32>
      %c0_40 = arith.constant 0 : index
      %c0_41 = arith.constant 0 : index
      %c0_42 = arith.constant 0 : index
      %62 = vector.load %arg4[%c0_40, %c0_41, %c0_42] : memref<1x32x1xf32, #tpu.memory_space<vmem>>, vector<1x32x1xf32>
      %63 = vector.shape_cast %62 : vector<1x32x1xf32> to vector<32x1xf32>
      %64 = vector.shape_cast %61 : vector<32x1xf32> to vector<1x32x1xf32>
      tpu.vector_store %arg4[%c0_40, %c0_41, %c0_42], %64 {strides = array<i32>} : memref<1x32x1xf32, #tpu.memory_space<vmem>>, vector<1x32x1xf32>,
    } else {
    }
    return
  }
  func.func @transform_0(%arg0: i32, %arg1: i32) -> i32 {
    %c0_i32 = arith.constant 0 : i32
    %c0_i32_0 = arith.constant 0 : i32
    return %c0_i32 : i32
  }
  func.func @transform_1(%arg0: i32, %arg1: i32) -> (i32, i32, i32) {
    %c0_i32 = arith.constant 0 : i32
    %c0_i32_0 = arith.constant 0 : i32
    return %arg0, %c0_i32, %arg1 : i32, i32, i32
  }
  func.func @transform_2(%arg0: i32, %arg1: i32) -> (i32, i32, i32) {
    %c0_i32 = arith.constant 0 : i32
    %c0_i32_0 = arith.constant 0 : i32
    %c0_i32_1 = arith.constant 0 : i32
    return %arg0, %c0_i32, %c0_i32_0 : i32, i32, i32
  }
}

</mosaic_0001>

<bundles_post_ra>
// kernel: tpu_custom_call.1
= control target key start
LH: loop header
LB: loop body
LE: loop exit
PB: predicated region body
PF: predicated region fallthrough
CT: control target
= control target key end

     0   :  { %s980_s0 = inlined_call_operand.hbm [shape: f32[6], index: 0, kind: input, shape index: {}]   ;;  %s981_s1 = inlined_call_operand.hbm [shape: f32[2,32,256], index: 1, kind: input, shape index: {}]   ;;  %s982_s2 = inlined_call_operand.vmem [shape: f32[2,32,1], index: 2, kind: output, shape index: {}]  }
   0x1   :  { %984 = sst [smem:[#allocation12_spill]] %s980_s0 }
   0x2   :  { %7 = vsyncpa [#allocation7], 0 }
   0x3   :  { %8 = vsyncpa [#allocation6], 0 }
   0x4   :  { %10 = vsyncpa [#allocation6 + $0x1], 0  ;;  %s806_s9 = smov 0   ;;  %s808_s10 = smov 0  }
   0x5   :  { %s810_s11 = smov 0   ;;  %s812_s12 = smov 0  }
   0x6   :  { %s814_s13 = smov 0   ;;  %s816_s14 = smov 0  }
   0x7   :  { %s818_s15 = smov 0   ;;  %s820_s16 = smov 0  }
   0x8 LB: > { %s537_s17 = sadd.s32 4294967295, %s779_s16   ;;  %s58_s18 = sadd.s32 1, %s759_s11  ;;  %s779_s16 = sphi %s820_s16, %s16_s16   ;;  %s775_s15 = sphi %s818_s15, %s998_s15   ;;  %s771_s14 = sphi %s816_s14, %s997_s14   ;;  %s767_s13 = sphi %s814_s13, %s996_s13   ;;  %s763_s12 = sphi %s812_s12, %s995_s12   ;;  %s759_s11 = sphi %s810_s11, %s994_s11   ;;  %s755_s10 = sphi %s808_s10, %s993_s10   ;;  %s751_s9 = sphi %s806_s9, %s992_s9  }
   0x9   : > { %p65_p0 = scmp.ne.s32.totalorder %s759_s11, %s755_s10  ;;  %p66_p1 = scmp.eq.s32.totalorder %s779_s16, 0 }
   0xa   : > { %p71_p2 = scmp.ne.s32.totalorder %s755_s10, %s751_s9  ;;  %p850_p3 = scmp.eq.s32.totalorder %s537_s17, 0 }
   0xb   : > { %p67_p4 = por %p66_p1, %p65_p0  ;;  %p539_p5 = scmp.ge.s32.totalorder %s779_s16, 1 }
   0xc   : > { %p857_p6 = por %p850_p3, %p71_p2  ;;  %p108_p7 = scmp.lt.s32.totalorder %s779_s16, 5 }
   0xd   : > { %p579_p9 = scmp.lt.s32.totalorder %s779_s16, 4  ;;  %s25_s23 = sadd.s32 1, %s771_s14 }
   0xe   : > { %p862_p8 = pnand %p539_p5, %p108_p7  ;;  %p26_p13 = scmp.ge.s32.totalorder %s25_s23, 2 }
   0xf   : > { %p869_p11 = pnand %p579_p9, %p67_p4  ;;  %s781_s24 = smov [#allocation5]  }
  0x10   : > { %p570_p10 = pneg %p862_p8  ;;  %s989_s0 = sld [smem:[#allocation12_spill]] }
  0x11   : > { %s1000_s23 = smov (%p26_p13, %s25_s23), 0  ;;  %s28_s27 = sadd.s32 1, %s775_s15 }
  0x12   : > { %p571_p12 = pnand %p570_p10, %p850_p3  ;;  %990 = sst [smem:[#allocation11_spill]] %s1000_s23 }
  0x13   : > { %s130_s28 = sand.u32 1, %s759_s11   ;;  %s1002_s27 = smov (!%p26_p13, %s28_s27), %s775_s15 }
  0x14   : > { %s54_s29 = ssub.s32 %s771_s14, %s1000_s23  ;;  %p30_p0 = scmp.ge.s32.totalorder %s1002_s27, 2 }
  0x15   : > { %s542_s30 = sshll.u32 %s130_s28, 5  ;;  %s543_s3 = sshll.u32 %s775_s15, 3 }
  0x16   : > { %573 = dma.hbm_to_smem (!%p571_p12), %s989_s0, 16, %s781_s24, [#allocation7]  }
  0x17   : > { %s1004_s27 = smov (%p30_p0, %s1002_s27), 0  ;;  %s139_s4 = sadd.s32 %s771_s14, %s543_s3 }
  0x18   : > { %s134_s5 = scalar_lea.vmem [#allocation8], %s542_s30  ;;  %s53_s7 = ssub.s32 %s775_s15, %s1004_s27 }
  0x19   : > { %s142_s6 = sshll.u32 %s134_s5, 4  ;;  %s544_s8 = sshll.u32 %s139_s4, 7  ;;  %s143_s6 = int_to_ptr.vmem [resolvable:$true] %s142_s6 }
  0x1a   : > { %s55_s9 = sor.u32 %s54_s29, %s53_s7  ;;  %s141_s25 = scalar_lea.hbm %s981_s1, %s544_s8 }
  0x1b   : > { %p56_p1 = scmp.eq.s32.totalorder %s55_s9, 0  ;;  %s131_s0 = scalar_lea.sflag [#allocation6], %s130_s28 }
  0x1c   : > { %p683_p2 = pneg %p869_p11  ;;  %s694_s23 = scalar_lea.vmem %s143_s6, 512 }
  0x1d   : > { %s898_s26 = scalar_select %p56_p1, %s759_s11, %s58_s18  }
  0x1e   : > { %p695_p4 = scmp.ne.s32.totalorder %s143_s6, %s694_s23  ;;  %s782_s30 = smov [#allocation8]  }
  0x1f   : > { %s699_s3 = sshll.u32 %s782_s30, 4  ;;  %s700_s3 = int_to_ptr.vmem [resolvable:$false] %s699_s3 }
  0x20   : > { %p697_p5 = pnand %p695_p4, %p683_p2  ;;  %s701_s29 = scalar_lea.vmem %s700_s3, 1024 }
  0x21   : > { %p702_p9 = scmp.lt.s32.totalorder %s143_s6, %s700_s3  ;;  %p703_p10 = scmp.lt.s32.totalorder %s701_s29, %s694_s23 }
  0x22   : > { %p698_p7 = pneg %p697_p5 }
  0x23   : > { %p704_p12 = por %p703_p10, %p702_p9 }
  0x25   : > { %p705_p13 = pnand %p704_p12, %p698_p7 }
  0x27   : > { %708 = shalt.err (!%p705_p13)
}
  0x28   : > { %s783_s4 = smov 256   ;;  %s784_s18 = smov 128  }
  0x29   : > { %s785_s5 = smov 8   ;;  %154 = sbr.rel (%p862_p8) target bundleno = 521 (0x209), region = 28 }
  0x2a   : > { %577 = dma.hbm_to_vmem [thread:$0]  (!%p869_p11), %s141_s25, 512, %s143_s6, %s131_s0, %s783_s4, %s784_s18, %s785_s5  }
  0x2e   : > { %742 = dma.done.wait (%p850_p3), [#allocation7], 16  }
  0x2f   : > { %744 = vsyncadd (%p850_p3), [#allocation7], 4294967280  ;;  %s160_s23 = sand.u32 1, %s755_s10  }
  0x30   : > { %s547_s28 = sshll.u32 %s160_s23, 5  ;;  %s161_s7 = scalar_lea.sflag [#allocation6], %s160_s23 }
  0x31   : > { %s164_s8 = scalar_lea.vmem [#allocation8], %s547_s28 }
  0x32   : > { %746 = dma.done.wait (%p857_p6), %s161_s7, 512  }
  0x33   : > { %748 = vsyncadd (%p857_p6), %s161_s7, 4294966784 }
  0x34   : > { %169 = sfence }
  0x35   : > { %p186_p8 = scmp.lt.s32.totalorder %s767_s13, 1  ;;  %p550_p3 = scmp.ne.s32.totalorder %s763_s12, 0 }
  0x37   : > { %s1006_s13 = smov (!%p186_p8, %s767_s13), 1  ;;  %194 = sbr.rel (%p550_p3) target bundleno = 65 (0x41), region = 40 }
  0x38   : > { %s563_s0 = sshll.u32 %s1006_s13, 5 }
  0x39   : > { %s920_s22 = scalar_lea.vmem %s982_s2, %s563_s0 }
  0x3c   : > { %vm195_vm0 = vcmask 7168   ;;  %v786_v0 = vmov 0.0   ;;  %v787_v1 = vmov -inf  }
  0x3d   : > { %196 = vst.msk [vmem:[#allocation2] sm:$0xff] %vm195_vm0, %v786_v0  ;;  %197 = vst.msk [vmem:[#allocation2 + $0x8] sm:$0xff] %vm195_vm0, %v786_v0 }
  0x3e   : > { %198 = vst.msk [vmem:[#allocation2 + $0x10] sm:$0xff] %vm195_vm0, %v786_v0  ;;  %199 = vst.msk [vmem:[#allocation2 + $0x18] sm:$0xff] %vm195_vm0, %v786_v0 }
  0x3f   : > { %200 = vst.msk [vmem:[#allocation3] sm:$0xff] %vm195_vm0, %v787_v1  ;;  %201 = vst.msk [vmem:[#allocation3 + $0x8] sm:$0xff] %vm195_vm0, %v787_v1 }
  0x40   : > { %202 = vst.msk [vmem:[#allocation3 + $0x10] sm:$0xff] %vm195_vm0, %v787_v1  ;;  %203 = vst.msk [vmem:[#allocation3 + $0x18] sm:$0xff] %vm195_vm0, %v787_v1 }
  0x41 PF: > { %v206_v2 = vld [vmem:[%s164_s8 + $0x10] sm:$0xff]  ;;  %v204_v3 = vld [vmem:[%s164_s8] sm:$0xff]  ;;  %v207_v4 = vld [vmem:[%s164_s8 + $0x18] sm:$0xff]  ;;  %vm224_vm1 = vcmask 7168   ;;  %p551_p6 = scmp.ne.s32.totalorder %s763_s12, 1 }
  0x42   : > { %216 = vadd.xlane.f32.xlu1 %v206_v2  ;;  %212 = vadd.xlane.f32.xlu0 %v204_v3  ;;  %v205_v5 = vld [vmem:[%s164_s8 + $0x8] sm:$0xff]  ;;  %s788_s13 = smov (!%p551_p6), 1   ;;  %s552_s12 = sld [smem:[#allocation5 + $0x3]] (!%p551_p6) }
  0x43   : > { %s554_s20 = sld [smem:[#allocation5 + $0x4]] (!%p551_p6)  ;;  %s790_s6 = smov (!%p551_p6), 127  }
  0x44   : > { %v208_v7 = vld [vmem:[#allocation2] sm:$0xff]  ;;  %v209_v13 = vld [vmem:[#allocation2 + $0x8] sm:$0xff]  ;;  %s556_s9 = sld [smem:[#allocation5 + $0x5]] (!%p551_p6) }
  0x45   : > { %v210_v6 = vld [vmem:[#allocation2 + $0x10] sm:$0xff]  ;;  %v211_v12 = vld [vmem:[#allocation2 + $0x18] sm:$0xff]  ;;  %s297_s17 = sld [smem:[#allocation5]] (!%p551_p6) }
  0x46   : > { %218 = vadd.xlane.f32.xlu1 %v207_v4  ;;  %214 = vadd.xlane.f32.xlu0 %v205_v5  ;;  %v230_v18 = vld [vmem:[#allocation3 + $0x8] sm:$0xff]  ;;  %v229_v19 = vld [vmem:[#allocation3] sm:$0xff]  ;;  %s553_s24 = sld [smem:[#allocation5 + $0x1]] (!%p551_p6) }
  0x47   : > { %v232_v24 = vld [vmem:[#allocation3 + $0x18] sm:$0xff]  ;;  %v231_v25 = vld [vmem:[#allocation3 + $0x10] sm:$0xff]  ;;  %s555_s25 = sld [smem:[#allocation5 + $0x2]] (!%p551_p6) }
  0x4a   : > { %235 = vmax.xlane.f32.xlu1 %v205_v5  ;;  %233 = vmax.xlane.f32.xlu0 %v204_v3 }
  0x4e   : > { %239 = vmax.xlane.f32.xlu1 %v207_v4  ;;  %237 = vmax.xlane.f32.xlu0 %v206_v2 }
  0xcb   : > { %v217_v8 = vpop.xlane.xlu1 %216  ;;  %v213_v9 = vpop.xlane.xlu0 %212 }
  0xcc   : > { %v222_v10 = vadd.f32 %v217_v8, %v210_v6  ;;  %v220_v11 = vadd.f32 %v213_v9, %v208_v7 }
  0xce   : > { %227 = vst.msk [vmem:[#allocation2 + $0x10] sm:$0xff] %vm224_vm1, %v222_v10  ;;  %225 = vst.msk [vmem:[#allocation2] sm:$0xff] %vm224_vm1, %v220_v11 }
  0xcf   : > { %v219_v14 = vpop.xlane.xlu1 %218  ;;  %v215_v15 = vpop.xlane.xlu0 %214 }
  0xd0   : > { %v223_v16 = vadd.f32 %v219_v14, %v211_v12  ;;  %v221_v17 = vadd.f32 %v215_v15, %v209_v13 }
  0xd2   : > { %228 = vst.msk [vmem:[#allocation2 + $0x18] sm:$0xff] %vm224_vm1, %v223_v16  ;;  %226 = vst.msk [vmem:[#allocation2 + $0x8] sm:$0xff] %vm224_vm1, %v221_v17 }
  0xd3   : > { %v236_v20 = vpop.xlane.xlu1 %235  ;;  %v234_v21 = vpop.xlane.xlu0 %233 }
  0xd4   : > { %v242_v22 = vmax.f32 %v230_v18, %v236_v20  ;;  %v241_v23 = vmax.f32 %v229_v19, %v234_v21 }
  0xd6   : > { %246 = vst.msk [vmem:[#allocation3 + $0x8] sm:$0xff] %vm224_vm1, %v242_v22  ;;  %245 = vst.msk [vmem:[#allocation3] sm:$0xff] %vm224_vm1, %v241_v23  ;;  %252 = sbr.rel (%p551_p6) target bundleno = 521 (0x209), region = 44 }
  0xd7   : > { %v240_v26 = vpop.xlane.xlu1 %239  ;;  %v238_v27 = vpop.xlane.xlu0 %237 }
  0xd8   : > { %v244_v28 = vmax.f32 %v232_v24, %v240_v26  ;;  %v243_v29 = vmax.f32 %v231_v25, %v238_v27 }
  0xda   : > { %248 = vst.msk [vmem:[#allocation3 + $0x18] sm:$0xff] %vm224_vm1, %v244_v28  ;;  %247 = vst.msk [vmem:[#allocation3 + $0x10] sm:$0xff] %vm224_vm1, %v243_v29 }
  0xdb   : > { %vm265_vm2 = vcmask 15360   ;;  %v789_v33 = vmov 0.0   ;;  %v255_v34 = vld [vmem:[#allocation2 + $0x10] sm:$0xff]  ;;  %v253_v35 = vld [vmem:[#allocation2] sm:$0xff]  ;;  %vm270_vm3 = vcmask 9216   ;;  %v256_v39 = vld [vmem:[#allocation2 + $0x18] sm:$0xff]  ;;  %v312_v47 = vstv %s552_s12 }
  0xdc   : > { %268 = vst.msk [vmem:[#allocation4 + $0x10] sm:$0xff] %vm265_vm2, %v789_v33  ;;  %269 = vst.msk [vmem:[#allocation4 + $0x18] sm:$0xff] %vm265_vm2, %v789_v33  ;;  %v259_v37 = vmul.f32 0.00390625, %v255_v34  ;;  %v257_v38 = vmul.f32 0.00390625, %v253_v35  ;;  %v254_v40 = vld [vmem:[#allocation2 + $0x8] sm:$0xff]  ;;  %v260_v41 = vmul.f32 0.00390625, %v256_v39  ;;  %v352_v56 = vstv %s554_s20 }
  0xdd   : > { %v261_v31 = vld [vmem:[#allocation3] sm:$0xff]  ;;  %266 = vst.msk [vmem:[#allocation4] sm:$0xff] %vm265_vm2, %v789_v33  ;;  %267 = vst.msk [vmem:[#allocation4 + $0x8] sm:$0xff] %vm265_vm2, %v789_v33  ;;  %v262_v36 = vld [vmem:[#allocation3 + $0x8] sm:$0xff]  ;;  %v258_v42 = vmul.f32 0.00390625, %v254_v40  ;;  %vm292_vm4 = vcmask 15368   ;;  %v392_v1 = vstv %s556_s9  ;;  %v302_v10 = vstv %s297_s17 }
  0xde   : > { %280 = vrot.lane.b32.xlu0 %v261_v31, %s788_s13  ;;  %271 = vst.msk [vmem:[#allocation4 + $0x20] sm:$0x3] %vm270_vm3, %v789_v33  ;;  %v342_v11 = vstv %s553_s24  ;;  %v382_v25 = vstv %s555_s25 }
  0xdf   : > { %274 = vst.msk [vmem:[#allocation4 + $0x11] sm:$0xff] %vm224_vm1, %v259_v37  ;;  %272 = vst.msk [vmem:[#allocation4 + $0x1] sm:$0xff] %vm224_vm1, %v257_v38 }
  0xe0   : > { %275 = vst.msk [vmem:[#allocation4 + $0x19] sm:$0xff] %vm224_vm1, %v260_v41  ;;  %273 = vst.msk [vmem:[#allocation4 + $0x9] sm:$0xff] %vm224_vm1, %v258_v42 }
  0xe1   : > { %v263_v30 = vld [vmem:[#allocation3 + $0x10] sm:$0xff]  ;;  %v264_v32 = vld [vmem:[#allocation3 + $0x18] sm:$0xff] }
  0xe2   : > { %284 = vrot.lane.b32.xlu1 %v263_v30, %s788_s13  ;;  %282 = vrot.lane.b32.xlu0 %v262_v36, %s788_s13 }
  0xe6   : > { %286 = vrot.lane.b32.xlu1 %v264_v32, %s788_s13 }
 0x150   : > { %v281_v44 = vpop.permute.xlu0 %280 }
 0x151   : > { %293 = vst.msk [vmem:[#allocation4 + $0x1] sm:$0xff] %vm292_vm4, %v281_v44 }
 0x154   : > { %v285_v43 = vpop.permute.xlu1 %284  ;;  %v283_v46 = vpop.permute.xlu0 %282 }
 0x155   : > { %295 = vst.msk [vmem:[#allocation4 + $0x11] sm:$0xff] %vm292_vm4, %v285_v43  ;;  %294 = vst.msk [vmem:[#allocation4 + $0x9] sm:$0xff] %vm292_vm4, %v283_v46 }
 0x158   : > { %v287_v45 = vpop.permute.xlu1 %286  ;;  %v298_v48 = vld [vmem:[#allocation4] sm:$0xff] }
 0x159   : > { %296 = vst.msk [vmem:[#allocation4 + $0x19] sm:$0xff] %vm292_vm4, %v287_v45  ;;  %v313_v49 = vmul.f32 %v312_v47, %v298_v48  ;;  %v338_v55 = vld [vmem:[#allocation4 + $0x1] sm:$0xff]  ;;  %v303_v12 = vmul.f32 %v302_v10, %v298_v48 }
 0x15a   : > { %v353_v58 = vmul.f32 %v352_v56, %v338_v55  ;;  %v343_v15 = vmul.f32 %v342_v11, %v338_v55 }
 0x15b   : > { %321 = vrot.lane.b32.xlu0 %v313_v49, %s790_s6 }
 0x15c   : > { %v299_v50 = vld [vmem:[#allocation4 + $0x8] sm:$0xff]  ;;  %v300_v51 = vld [vmem:[#allocation4 + $0x10] sm:$0xff] }
 0x15d   : > { %v314_v52 = vmul.f32 %v312_v47, %v299_v50  ;;  %v315_v53 = vmul.f32 %v312_v47, %v300_v51  ;;  %v339_v59 = vld [vmem:[#allocation4 + $0x9] sm:$0xff]  ;;  %v340_v60 = vld [vmem:[#allocation4 + $0x11] sm:$0xff]  ;;  %v304_v16 = vmul.f32 %v302_v10, %v299_v50  ;;  %v305_v17 = vmul.f32 %v302_v10, %v300_v51 }
 0x15e   : > { %v354_v61 = vmul.f32 %v352_v56, %v339_v59  ;;  %v355_v62 = vmul.f32 %v352_v56, %v340_v60  ;;  %v378_v0 = vld [vmem:[#allocation4 + $0x2] sm:$0xff]  ;;  %v379_v4 = vld [vmem:[#allocation4 + $0xa] sm:$0xff]  ;;  %v344_v23 = vmul.f32 %v342_v11, %v339_v59  ;;  %v345_v24 = vmul.f32 %v342_v11, %v340_v60 }
 0x15f   : > { %323 = vrot.lane.b32.xlu1 %v314_v52, %s790_s6  ;;  %325 = vrot.lane.b32.xlu0 %v315_v53, %s790_s6  ;;  %v393_v3 = vmul.f32 %v392_v1, %v378_v0  ;;  %v394_v6 = vmul.f32 %v392_v1, %v379_v4  ;;  %v383_v34 = vmul.f32 %v382_v25, %v378_v0 }
 0x160   : > { %v301_v54 = vld [vmem:[#allocation4 + $0x18] sm:$0xff]  ;;  %v384_v41 = vmul.f32 %v382_v25, %v379_v4 }
 0x161   : > { %v316_v57 = vmul.f32 %v312_v47, %v301_v54  ;;  %v341_v63 = vld [vmem:[#allocation4 + $0x19] sm:$0xff]  ;;  %v306_v26 = vmul.f32 %v302_v10, %v301_v54 }
 0x162   : > { %v356_v2 = vmul.f32 %v352_v56, %v341_v63  ;;  %v380_v5 = vld [vmem:[#allocation4 + $0x12] sm:$0xff]  ;;  %v381_v8 = vld [vmem:[#allocation4 + $0x1a] sm:$0xff]  ;;  %v346_v33 = vmul.f32 %v342_v11, %v341_v63 }
 0x163   : > { %327 = vrot.lane.b32.xlu1 %v316_v57, %s790_s6  ;;  %361 = vrot.lane.b32.xlu0 %v353_v58, %s790_s6  ;;  %v395_v7 = vmul.f32 %v392_v1, %v380_v5  ;;  %v396_v9 = vmul.f32 %v392_v1, %v381_v8  ;;  %v385_v42 = vmul.f32 %v382_v25, %v380_v5 }
 0x164   : > { %v386_v49 = vmul.f32 %v382_v25, %v381_v8 }
 0x167   : > { %363 = vrot.lane.b32.xlu1 %v354_v61, %s790_s6  ;;  %365 = vrot.lane.b32.xlu0 %v355_v62, %s790_s6 }
 0x16b   : > { %367 = vrot.lane.b32.xlu1 %v356_v2, %s790_s6  ;;  %401 = vrot.lane.b32.xlu0 %v393_v3, %s790_s6 }
 0x16f   : > { %403 = vrot.lane.b32.xlu1 %v394_v6, %s790_s6  ;;  %405 = vrot.lane.b32.xlu0 %v395_v7, %s790_s6 }
 0x173   : > { %407 = vrot.lane.b32.xlu1 %v396_v9, %s790_s6 }
 0x1cd   : > { %v322_v13 = vpop.permute.xlu0 %321 }
 0x1ce   : > { %v333_v14 = vadd.f32 %v322_v13, %v303_v12 }
 0x1d0   : > { %v347_v18 = vadd.f32 %v343_v15, %v333_v14 }
 0x1d1   : > { %v324_v19 = vpop.permute.xlu1 %323  ;;  %v326_v20 = vpop.permute.xlu0 %325 }
 0x1d2   : > { %v334_v21 = vadd.f32 %v324_v19, %v304_v16  ;;  %v335_v22 = vadd.f32 %v326_v20, %v305_v17 }
 0x1d4   : > { %v348_v27 = vadd.f32 %v344_v23, %v334_v21  ;;  %v349_v28 = vadd.f32 %v345_v24, %v335_v22 }
 0x1d5   : > { %v328_v29 = vpop.permute.xlu1 %327  ;;  %v362_v30 = vpop.permute.xlu0 %361 }
 0x1d6   : > { %v336_v31 = vadd.f32 %v328_v29, %v306_v26  ;;  %v373_v32 = vadd.f32 %v362_v30, %v347_v18 }
 0x1d8   : > { %v350_v35 = vadd.f32 %v346_v33, %v336_v31  ;;  %v387_v36 = vadd.f32 %v383_v34, %v373_v32 }
 0x1d9   : > { %v364_v37 = vpop.permute.xlu1 %363  ;;  %v366_v38 = vpop.permute.xlu0 %365 }
 0x1da   : > { %v374_v39 = vadd.f32 %v364_v37, %v348_v27  ;;  %v375_v40 = vadd.f32 %v366_v38, %v349_v28 }
 0x1dc   : > { %v388_v43 = vadd.f32 %v384_v41, %v374_v39  ;;  %v389_v44 = vadd.f32 %v385_v42, %v375_v40 }
 0x1dd   : > { %v368_v45 = vpop.permute.xlu1 %367  ;;  %v402_v46 = vpop.permute.xlu0 %401 }
 0x1de   : > { %v376_v47 = vadd.f32 %v368_v45, %v350_v35  ;;  %v413_v48 = vadd.f32 %v402_v46, %v387_v36 }
 0x1e0   : > { %v557_v50 = vmul.f32 -1.442695, %v413_v48  ;;  %v390_v51 = vadd.f32 %v386_v49, %v376_v47 }
 0x1e1   : > { %v404_v52 = vpop.permute.xlu1 %403  ;;  %v406_v53 = vpop.permute.xlu0 %405 }
 0x1e2   : > { %654 = vpow2.f32 %v557_v50  ;;  %v414_v54 = vadd.f32 %v404_v52, %v388_v43  ;;  %v415_v55 = vadd.f32 %v406_v53, %v389_v44 }
 0x1e4   : > { %v558_v56 = vmul.f32 -1.442695, %v414_v54  ;;  %v559_v57 = vmul.f32 -1.442695, %v415_v55 }
 0x1e5   : > { %v408_v58 = vpop.permute.xlu1 %407 }
 0x1e6   : > { %656 = vpow2.f32 %v558_v56  ;;  %v416_v59 = vadd.f32 %v408_v58, %v390_v51 }
 0x1e7   : > { %658 = vpow2.f32 %v559_v57 }
 0x1e8   : > { %v560_v60 = vmul.f32 -1.442695, %v416_v59 }
 0x1ea   : > { %660 = vpow2.f32 %v560_v60 }
 0x1ef   : > { %v655_v61 = vpop.eup %654 }
 0x1f0   : > { %v429_v62 = vadd.f32 1.0, %v655_v61 }
 0x1f2   : > { %662 = vrcp.f32 %v429_v62 }
 0x1f3   : > { %v657_v63 = vpop.eup %656 }
 0x1f4   : > { %v659_v0 = vpop.eup %658  ;;  %v430_v1 = vadd.f32 1.0, %v657_v63 }
 0x1f5   : > { %v431_v2 = vadd.f32 1.0, %v659_v0 }
 0x1f6   : > { %664 = vrcp.f32 %v430_v1 }
 0x1f7   : > { %v661_v3 = vpop.eup %660  ;;  %666 = vrcp.f32 %v431_v2 }
 0x1f8   : > { %v432_v4 = vadd.f32 1.0, %v661_v3 }
 0x1fa   : > { %668 = vrcp.f32 %v432_v4 }
 0x1ff   : > { %v663_v5 = vpop.eup %662 }
 0x200   : > { %441 = vst.msk [vmem:[%s920_s22] sm:$0xff] %vm224_vm1, %v663_v5 }
 0x203   : > { %v665_v6 = vpop.eup %664 }
 0x204   : > { %v667_v7 = vpop.eup %666  ;;  %442 = vst.msk [vmem:[%s920_s22 + $0x8] sm:$0xff] %vm224_vm1, %v665_v6 }
 0x205   : > { %443 = vst.msk [vmem:[%s920_s22 + $0x10] sm:$0xff] %vm224_vm1, %v667_v7 }
 0x207   : > { %v669_v8 = vpop.eup %668 }
 0x208   : > { %444 = vst.msk [vmem:[%s920_s22 + $0x18] sm:$0xff] %vm224_vm1, %v669_v8 }
 0x209 PF: > { %s16_s16 = sadd.s32 1, %s779_s16   ;;  %s991_s30 = sld [smem:[#allocation11_spill]] }
 0x20a   : > { %p13_p11 = scmp.ge.s32.totalorder %s16_s16, 6   ;;  %s992_s9 = smov %s755_s10 }
 0x20b   : > { %s993_s10 = smov %s759_s11  ;;  %s994_s11 = smov %s898_s26 }
 0x20c   : > { %s995_s12 = smov %s771_s14  ;;  %s996_s13 = smov %s775_s15 }
 0x20d   : > { %s998_s15 = smov %s1004_s27  ;;  %15 = sbr.rel (!%p13_p11) target bundleno = 8 (0x8), region = 81 }
 0x20f   : > { %s997_s14 = smov %s991_s30 }
 0x212   :  { %466 = vsyncpa [#allocation6], 1 }
 0x213   :  { %468 = vsyncpa [#allocation6 + $0x1], 1 }
 0x214   :  { %469 = vsyncpa [#allocation7], 1 }
 0x215   :  { %471 = vsyncpa [#allocation7 + $0x1], 1 }

</bundles_post_ra>
